<compile_context>
chip_gen: v7x
topology: tpu7x:2x2x1
jax: 0.10.0
libtpu: 0.0.40
codegen_flags: <defaults>
</compile_context>

<pallas_src>
import functools

import jax
import jax.numpy as jnp
import numpy as np
from jax import lax
from jax.experimental import pallas as pl
from jax.experimental.pallas import tpu as pltpu


def _lstm_layer_kernel(x_ref, wih_ref, whh_ref, bg_ref, whead_ref, bhead_ref,
                       out_ref, xg_sc, hx_sc, *, n_steps, rows):
    """One batch chunk.

    x_ref   : (T*rows, F)      bf16, time-major flattened input chunk
    wih_ref : (F, 4F)          bf16, fused/pre-scaled input-gate weights [i|f|g|o]
    whh_ref : (F, 4F)          bf16, fused/pre-scaled recurrent-gate weights
    bg_ref  : (1, 4F)          f32,  fused/pre-scaled gate bias (b_ih + b_hh)
    whead_ref: (2F, Fpad)      bf16, fused head weight [rows 0:F multiply h, F:2F multiply x]
    bhead_ref: (1, Fpad)       f32,  head bias (zero padded)
    out_ref : (T*rows, Fpad)   f32
    xg_sc   : (T*rows, 4F)     f32 scratch, hoisted input projections
    hx_sc   : (T*rows, 2F)     f32 scratch, [h_t | x_t] operand of the fused head
    """
    f = x_ref.shape[-1]
    x_bf = x_ref[...]                                     # (T*rows, F) bf16

    # ---- hoisted, fused input projection (one lane-dense matmul, bias folded) -
    xg_sc[...] = (jnp.dot(x_bf, wih_ref[...], preferred_element_type=jnp.float32)
                  + bg_ref[...])

    # Pre-fill the residual (x) half of the fused-head operand.
    hx_sc[:, pl.ds(f, f)] = x_bf.astype(jnp.float32)

    whh_all = whh_ref[...]                                # (F, 4F) bf16, loop-invariant

    # ---- serial recurrence: ONE fused matmul + ONE full-vreg tanh per step ----
    def step(t, carry):
        h_prev, c_prev = carry                            # f32 (rows, F)
        r0 = pl.multiple_of(t * rows, rows)               # 8-aligned sublane offset
        pre = xg_sc[pl.ds(r0, rows)] + jnp.dot(
            h_prev.astype(jnp.bfloat16), whh_all,
            preferred_element_type=jnp.float32)           # (rows, 4F) f32
        tg = jnp.tanh(pre)                                # all 4 gates in one EUP pass
        i_g = 0.5 * (tg[:, 0 * f:1 * f] + 1.0)            # sigmoid via pre-scaled tanh
        f_g = 0.5 * (tg[:, 1 * f:2 * f] + 1.0)
        g_g = tg[:, 2 * f:3 * f]
        o_g = 0.5 * (tg[:, 3 * f:4 * f] + 1.0)
        c_new = f_g * c_prev + i_g * g_g
        h_new = o_g * jnp.tanh(c_new)
        hx_sc[pl.ds(r0, rows), pl.ds(0, f)] = h_new       # stash h_t for deferred head
        return h_new, c_new

    h0 = jnp.zeros((rows, f), jnp.float32)
    c0 = jnp.zeros((rows, f), jnp.float32)
    lax.fori_loop(0, n_steps, step, (h0, c0),
                  unroll=True if n_steps <= 16 else 8)

    # ---- deferred, fused output head: single matmul + lane-dense writeback ----
    y = jnp.tanh(
        jnp.dot(hx_sc[...].astype(jnp.bfloat16), whead_ref[...],
                preferred_element_type=jnp.float32)
        + bhead_ref[...])
    out_ref[...] = y.astype(out_ref.dtype)                # unmasked 128-lane stores


def lstm_layer_forward(x, params):
    """x: (B, T, F) batch-first float32 (matches the PyTorch module). Returns (B, T, F)."""
    B, T, F = x.shape
    w_ih, w_hh, b_ih, b_hh, w_lin, b_lin = params

    # ---- weight prep (plain JAX glue) ----------------------------------------
    # Fused gate panels: columns ordered [i | f | g | o] (PyTorch gate order).
    # i/f/o columns pre-scaled by 0.5 so sigmoid(z) = 0.5*(tanh(z/2)+1) lets the
    # kernel use a single tanh over the whole (rows, 4F) pre-activation.
    gate_scale = jnp.concatenate([
        jnp.full((F,), 0.5), jnp.full((F,), 0.5),
        jnp.ones((F,)), jnp.full((F,), 0.5)]).astype(jnp.float32)       # (4F,)
    wih_all = (w_ih.T * gate_scale).astype(jnp.bfloat16)                # (F, 4F)
    whh_all = (w_hh.T * gate_scale).astype(jnp.bfloat16)                # (F, 4F)
    bg_all = ((b_ih + b_hh) * gate_scale).reshape(1, 4 * F).astype(jnp.float32)

    # Fused output head.  rearrange([h, x], 'c b t f -> b t (f c)') + Linear(2F->F)
    # is h @ W[:,0::2].T + x @ W[:,1::2].T + b.  Concat along K and zero-pad the
    # output columns to a multiple of 128 lanes so the final store is unmasked.
    Fpad = ((F + 127) // 128) * 128
    w_head = jnp.concatenate([w_lin[:, 0::2].T, w_lin[:, 1::2].T], axis=0)  # (2F, F)
    w_head = jnp.pad(w_head, ((0, 0), (0, Fpad - F))).astype(jnp.bfloat16)  # (2F, Fpad)
    b_head = jnp.pad(b_lin, (0, Fpad - F)).reshape(1, Fpad).astype(jnp.float32)

    # ---- batch padding / chunking ---------------------------------------------
    # Pad batch to a sublane multiple; split it into independent chunks so the
    # recurrence can run on both TensorCores on v7x ("parallel" grid axis).
    Bp = max(8, ((B + 7) // 8) * 8)
    n_chunks = 2 if (Bp >= 16 and Bp % 16 == 0) else 1
    rows = Bp // n_chunks

    x_tm = jnp.transpose(x, (1, 0, 2))                                  # (T, B, F)
    x_tm = jnp.pad(x_tm, ((0, 0), (0, Bp - B), (0, 0)))                 # (T, Bp, F)
    x_c = (x_tm.reshape(T, n_chunks, rows, F)
           .transpose(1, 0, 2, 3)
           .reshape(n_chunks, T * rows, F)
           .astype(jnp.bfloat16))

    vmem_resident = pl.BlockSpec(memory_space=pltpu.MemorySpace.VMEM)   # single copy

    out_c = pl.pallas_call(
        functools.partial(_lstm_layer_kernel, n_steps=T, rows=rows),
        out_shape=jax.ShapeDtypeStruct((n_chunks, T * rows, Fpad), jnp.float32),
        grid_spec=pltpu.PrefetchScalarGridSpec(
            num_scalar_prefetch=0,
            grid=(n_chunks,),
            in_specs=[
                pl.BlockSpec((None, T * rows, F), lambda b: (b, 0, 0)),  # x chunk
                vmem_resident,   # W_ih fused panel
                vmem_resident,   # W_hh fused panel
                vmem_resident,   # fused gate bias
                vmem_resident,   # fused head weight
                vmem_resident,   # head bias
            ],
            out_specs=pl.BlockSpec((None, T * rows, Fpad), lambda b: (b, 0, 0)),
            scratch_shapes=[
                pltpu.VMEM((T * rows, 4 * F), jnp.float32),   # hoisted projections
                pltpu.VMEM((T * rows, 2 * F), jnp.float32),   # [h | x] head operand
            ],
        ),
        compiler_params=pltpu.CompilerParams(
            dimension_semantics=("parallel",),   # batch chunks are independent
        ),
    )(x_c, wih_all, whh_all, bg_all, w_head, b_head)

    out = out_c[:, :, :F]                                               # drop lane pad
    out = (out.reshape(n_chunks, T, rows, F)
           .transpose(1, 0, 2, 3)
           .reshape(T, Bp, F)[:, :B, :])                                # drop batch pad
    return jnp.transpose(out, (1, 0, 2))                                # (B, T, F)


def _reference_forward(x, params):
    """Pure-JAX f32 reference matching the PyTorch module (eval mode)."""
    w_ih, w_hh, b_ih, b_hh, w_lin, b_lin = params
    B, T, F = x.shape

    def step(carry, x_t):
        h, c = carry
        gates = x_t @ w_ih.T + b_ih + h @ w_hh.T + b_hh
        i = jax.nn.sigmoid(gates[:, 0 * F:1 * F])
        f = jax.nn.sigmoid(gates[:, 1 * F:2 * F])
        g = jnp.tanh(gates[:, 2 * F:3 * F])
        o = jax.nn.sigmoid(gates[:, 3 * F:4 * F])
        c = f * c + i * g
        h = o * jnp.tanh(c)
        return (h, c), h

    h0 = jnp.zeros((B, F), jnp.float32)
    c0 = jnp.zeros((B, F), jnp.float32)
    _, hs = lax.scan(step, (h0, c0), jnp.transpose(x, (1, 0, 2)))
    lstm_out = jnp.transpose(hs, (1, 0, 2))                             # (B, T, F)

    # rearrange([lstm_out, x], 'c b t f -> b t (f c)')
    cat = jnp.stack([lstm_out, x], axis=-1).reshape(B, T, 2 * F)
    return jnp.tanh(cat @ w_lin.T + b_lin)                              # dropout = identity


def init_params(key, n_feature=32):
    """Deterministic parameter init (PyTorch-style uniform(-1/sqrt(H), 1/sqrt(H)))."""
    k = 1.0 / np.sqrt(n_feature)
    keys = jax.random.split(key, 6)
    u = lambda kk, shape, bound: jax.random.uniform(kk, shape, jnp.float32, -bound, bound)
    w_ih = u(keys[0], (4 * n_feature, n_feature), k)
    w_hh = u(keys[1], (4 * n_feature, n_feature), k)
    b_ih = u(keys[2], (4 * n_feature,), k)
    b_hh = u(keys[3], (4 * n_feature,), k)
    k_lin = 1.0 / np.sqrt(2 * n_feature)
    w_lin = u(keys[4], (n_feature, 2 * n_feature), k_lin)
    b_lin = u(keys[5], (n_feature,), k_lin)
    return (w_ih, w_hh, b_ih, b_hh, w_lin, b_lin)


if __name__ == "__main__":
    B, T, F = 2, 8, 32   # batch, seq, nFeature (module default nFeature=32)
    key = jax.random.PRNGKey(0)
    kx, kp = jax.random.split(key)
    x = jax.random.normal(kx, (B, T, F), jnp.float32)
    params = init_params(kp, F)

    out = lstm_layer_forward(x, params)
    out = jax.block_until_ready(out)

    ref = _reference_forward(x, params)
    # Tolerance is loosened vs. the pure-f32 version because the kernel feeds the
    # MXU bf16 operands (f32 accumulation); structural bugs would show as O(1e-1+).
    np.testing.assert_allclose(np.asarray(out), np.asarray(ref), rtol=5e-2, atol=3e-2)

    print("KERNEL_OK")
</pallas_src>

<mosaic_0001>
module attributes {stable_mosaic.version = 11 : i64} {
  func.func @_lstm_layer_kernel(%arg0: i32, %arg1: memref<1x64x32xbf16, #tpu.memory_space<vmem>>, %arg2: memref<32x128xbf16, #tpu.memory_space<vmem>>, %arg3: memref<32x128xbf16, #tpu.memory_space<vmem>>, %arg4: memref<1x128xf32, #tpu.memory_space<vmem>>, %arg5: memref<64x128xbf16, #tpu.memory_space<vmem>>, %arg6: memref<1x128xf32, #tpu.memory_space<vmem>>, %arg7: memref<1x64x128xf32, #tpu.memory_space<vmem>>, %arg8: memref<64x128xf32, #tpu.memory_space<vmem>>, %arg9: memref<64x64xf32, #tpu.memory_space<vmem>>) attributes {dimension_semantics = [#tpu.dimension_semantics<parallel>], iteration_bounds = array<i64: 1>, scalar_prefetch = 0 : i64, scratch_operands = 2 : i64, tpu.core_type = #tpu.core_type<tc>, window_params = [{transform_indices = @transform_0, window_bounds = array<i64: 1, 64, 32>}, {pipeline_mode = #tpu.pipeline_mode<synchronous>, transform_indices = @transform_1, window_bounds = array<i64: 32, 128>}, {pipeline_mode = #tpu.pipeline_mode<synchronous>, transform_indices = @transform_2, window_bounds = array<i64: 32, 128>}, {pipeline_mode = #tpu.pipeline_mode<synchronous>, transform_indices = @transform_3, window_bounds = array<i64: 1, 128>}, {pipeline_mode = #tpu.pipeline_mode<synchronous>, transform_indices = @transform_4, window_bounds = array<i64: 64, 128>}, {pipeline_mode = #tpu.pipeline_mode<synchronous>, transform_indices = @transform_5, window_bounds = array<i64: 1, 128>}, {transform_indices = @transform_6, window_bounds = array<i64: 1, 64, 128>}]} {
    %c0 = arith.constant 0 : index
    %c0_0 = arith.constant 0 : index
    %c0_1 = arith.constant 0 : index
    %0 = vector.load %arg1[%c0, %c0_0, %c0_1] : memref<1x64x32xbf16, #tpu.memory_space<vmem>>, vector<1x64x32xbf16>
    %1 = vector.shape_cast %0 : vector<1x64x32xbf16> to vector<64x32xbf16>
    %c0_2 = arith.constant 0 : index
    %c0_3 = arith.constant 0 : index
    %2 = vector.load %arg2[%c0_2, %c0_3] : memref<32x128xbf16, #tpu.memory_space<vmem>>, vector<32x128xbf16>
    %cst = arith.constant dense<0.000000e+00> : vector<64x128xf32>
    %3 = tpu.matmul %1, %2, %cst {dimension_numbers = #tpu.dot_dimension_numbers<[1], [0], [0], [1], [0, 0, 1, 1], [], []>} : vector<64x32xbf16>, vector<32x128xbf16>, vector<64x128xf32> -> vector<64x128xf32>
    %c0_4 = arith.constant 0 : index
    %c0_5 = arith.constant 0 : index
    %4 = vector.load %arg4[%c0_4, %c0_5] : memref<1x128xf32, #tpu.memory_space<vmem>>, vector<1x128xf32>
    %5 = vector.broadcast %4 : vector<1x128xf32> to vector<64x128xf32>
    %6 = arith.addf %3, %5 : vector<64x128xf32>
    %c0_6 = arith.constant 0 : index
    %c0_7 = arith.constant 0 : index
    %7 = vector.load %arg8[%c0_6, %c0_7] : memref<64x128xf32, #tpu.memory_space<vmem>>, vector<64x128xf32>
    tpu.vector_store %arg8[%c0_6, %c0_7], %6 {strides = array<i32>} : memref<64x128xf32, #tpu.memory_space<vmem>>, vector<64x128xf32>,
    %8 = arith.extf %1 : vector<64x32xbf16> to vector<64x32xf32>
    %c0_8 = arith.constant 0 : index
    %c32 = arith.constant 32 : index
    %9 = vector.load %arg9[%c0_8, %c32] : memref<64x64xf32, #tpu.memory_space<vmem>>, vector<64x32xf32>
    tpu.vector_store %arg9[%c0_8, %c32], %8 {strides = array<i32>} : memref<64x64xf32, #tpu.memory_space<vmem>>, vector<64x32xf32>,
    %c0_9 = arith.constant 0 : index
    %c0_10 = arith.constant 0 : index
    %10 = vector.load %arg3[%c0_9, %c0_10] : memref<32x128xbf16, #tpu.memory_space<vmem>>, vector<32x128xbf16>
    %cst_11 = arith.constant 0.000000e+00 : f32
    %11 = vector.broadcast %cst_11 : f32 to vector<8x32xf32>
    %cst_12 = arith.constant 0.000000e+00 : f32
    %12 = vector.broadcast %cst_12 : f32 to vector<8x32xf32>
    %c0_i32 = arith.constant 0 : i32
    %c8_i32 = arith.constant 8 : i32
    %13 = arith.muli %c0_i32, %c8_i32 : i32
    %14 = tpu.assume_multiple %13, 8 : i32
    %15 = arith.index_cast %14 : i32 to index
    %c0_13 = arith.constant 0 : index
    %16 = vector.load %arg8[%15, %c0_13] : memref<64x128xf32, #tpu.memory_space<vmem>>, vector<8x128xf32>
    %17 = arith.truncf %11 : vector<8x32xf32> to vector<8x32xbf16>
    %cst_14 = arith.constant dense<0.000000e+00> : vector<8x128xf32>
    %18 = tpu.matmul %17, %10, %cst_14 {dimension_numbers = #tpu.dot_dimension_numbers<[1], [0], [0], [1], [0, 0, 1, 1], [], []>} : vector<8x32xbf16>, vector<32x128xbf16>, vector<8x128xf32> -> vector<8x128xf32>
    %19 = arith.addf %16, %18 : vector<8x128xf32>
    %20 = math.tanh %19 : vector<8x128xf32>
    %21 = vector.extract_strided_slice %20 {offsets = [0, 0], sizes = [8, 32], strides = [1, 1]} : vector<8x128xf32> to vector<8x32xf32>
    %cst_15 = arith.constant 1.000000e+00 : f32
    %22 = vector.broadcast %cst_15 : f32 to vector<8x32xf32>
    %23 = arith.addf %21, %22 : vector<8x32xf32>
    %cst_16 = arith.constant 5.000000e-01 : f32
    %24 = vector.broadcast %cst_16 : f32 to vector<8x32xf32>
    %25 = arith.mulf %24, %23 : vector<8x32xf32>
    %26 = vector.extract_strided_slice %20 {offsets = [0, 32], sizes = [8, 32], strides = [1, 1]} : vector<8x128xf32> to vector<8x32xf32>
    %cst_17 = arith.constant 1.000000e+00 : f32
    %27 = vector.broadcast %cst_17 : f32 to vector<8x32xf32>
    %28 = arith.addf %26, %27 : vector<8x32xf32>
    %cst_18 = arith.constant 5.000000e-01 : f32
    %29 = vector.broadcast %cst_18 : f32 to vector<8x32xf32>
    %30 = arith.mulf %29, %28 : vector<8x32xf32>
    %31 = vector.extract_strided_slice %20 {offsets = [0, 64], sizes = [8, 32], strides = [1, 1]} : vector<8x128xf32> to vector<8x32xf32>
    %32 = vector.extract_strided_slice %20 {offsets = [0, 96], sizes = [8, 32], strides = [1, 1]} : vector<8x128xf32> to vector<8x32xf32>
    %cst_19 = arith.constant 1.000000e+00 : f32
    %33 = vector.broadcast %cst_19 : f32 to vector<8x32xf32>
    %34 = arith.addf %32, %33 : vector<8x32xf32>
    %cst_20 = arith.constant 5.000000e-01 : f32
    %35 = vector.broadcast %cst_20 : f32 to vector<8x32xf32>
    %36 = arith.mulf %35, %34 : vector<8x32xf32>
    %37 = arith.mulf %30, %12 : vector<8x32xf32>
    %38 = arith.mulf %25, %31 : vector<8x32xf32>
    %39 = arith.addf %37, %38 : vector<8x32xf32>
    %40 = math.tanh %39 : vector<8x32xf32>
    %41 = arith.mulf %36, %40 : vector<8x32xf32>
    %42 = arith.index_cast %14 : i32 to index
    %c0_21 = arith.constant 0 : index
    %43 = vector.load %arg9[%42, %c0_21] : memref<64x64xf32, #tpu.memory_space<vmem>>, vector<8x32xf32>
    tpu.vector_store %arg9[%42, %c0_21], %41 {strides = array<i32>} : memref<64x64xf32, #tpu.memory_space<vmem>>, vector<8x32xf32>,
    %c1_i32 = arith.constant 1 : i32
    %c8_i32_22 = arith.constant 8 : i32
    %44 = arith.muli %c1_i32, %c8_i32_22 : i32
    %45 = tpu.assume_multiple %44, 8 : i32
    %46 = arith.index_cast %45 : i32 to index
    %c0_23 = arith.constant 0 : index
    %47 = vector.load %arg8[%46, %c0_23] : memref<64x128xf32, #tpu.memory_space<vmem>>, vector<8x128xf32>
    %48 = arith.truncf %41 : vector<8x32xf32> to vector<8x32xbf16>
    %cst_24 = arith.constant dense<0.000000e+00> : vector<8x128xf32>
    %49 = tpu.matmul %48, %10, %cst_24 {dimension_numbers = #tpu.dot_dimension_numbers<[1], [0], [0], [1], [0, 0, 1, 1], [], []>} : vector<8x32xbf16>, vector<32x128xbf16>, vector<8x128xf32> -> vector<8x128xf32>
    %50 = arith.addf %47, %49 : vector<8x128xf32>
    %51 = math.tanh %50 : vector<8x128xf32>
    %52 = vector.extract_strided_slice %51 {offsets = [0, 0], sizes = [8, 32], strides = [1, 1]} : vector<8x128xf32> to vector<8x32xf32>
    %cst_25 = arith.constant 1.000000e+00 : f32
    %53 = vector.broadcast %cst_25 : f32 to vector<8x32xf32>
    %54 = arith.addf %52, %53 : vector<8x32xf32>
    %cst_26 = arith.constant 5.000000e-01 : f32
    %55 = vector.broadcast %cst_26 : f32 to vector<8x32xf32>
    %56 = arith.mulf %55, %54 : vector<8x32xf32>
    %57 = vector.extract_strided_slice %51 {offsets = [0, 32], sizes = [8, 32], strides = [1, 1]} : vector<8x128xf32> to vector<8x32xf32>
    %cst_27 = arith.constant 1.000000e+00 : f32
    %58 = vector.broadcast %cst_27 : f32 to vector<8x32xf32>
    %59 = arith.addf %57, %58 : vector<8x32xf32>
    %cst_28 = arith.constant 5.000000e-01 : f32
    %60 = vector.broadcast %cst_28 : f32 to vector<8x32xf32>
    %61 = arith.mulf %60, %59 : vector<8x32xf32>
    %62 = vector.extract_strided_slice %51 {offsets = [0, 64], sizes = [8, 32], strides = [1, 1]} : vector<8x128xf32> to vector<8x32xf32>
    %63 = vector.extract_strided_slice %51 {offsets = [0, 96], sizes = [8, 32], strides = [1, 1]} : vector<8x128xf32> to vector<8x32xf32>
    %cst_29 = arith.constant 1.000000e+00 : f32
    %64 = vector.broadcast %cst_29 : f32 to vector<8x32xf32>
    %65 = arith.addf %63, %64 : vector<8x32xf32>
    %cst_30 = arith.constant 5.000000e-01 : f32
    %66 = vector.broadcast %cst_30 : f32 to vector<8x32xf32>
    %67 = arith.mulf %66, %65 : vector<8x32xf32>
    %68 = arith.mulf %61, %39 : vector<8x32xf32>
    %69 = arith.mulf %56, %62 : vector<8x32xf32>
    %70 = arith.addf %68, %69 : vector<8x32xf32>
    %71 = math.tanh %70 : vector<8x32xf32>
    %72 = arith.mulf %67, %71 : vector<8x32xf32>
    %73 = arith.index_cast %45 : i32 to index
    %c0_31 = arith.constant 0 : index
    %74 = vector.load %arg9[%73, %c0_31] : memref<64x64xf32, #tpu.memory_space<vmem>>, vector<8x32xf32>
    tpu.vector_store %arg9[%73, %c0_31], %72 {strides = array<i32>} : memref<64x64xf32, #tpu.memory_space<vmem>>, vector<8x32xf32>,
    %c2_i32 = arith.constant 2 : i32
    %c8_i32_32 = arith.constant 8 : i32
    %75 = arith.muli %c2_i32, %c8_i32_32 : i32
    %76 = tpu.assume_multiple %75, 8 : i32
    %77 = arith.index_cast %76 : i32 to index
    %c0_33 = arith.constant 0 : index
    %78 = vector.load %arg8[%77, %c0_33] : memref<64x128xf32, #tpu.memory_space<vmem>>, vector<8x128xf32>
    %79 = arith.truncf %72 : vector<8x32xf32> to vector<8x32xbf16>
    %cst_34 = arith.constant dense<0.000000e+00> : vector<8x128xf32>
    %80 = tpu.matmul %79, %10, %cst_34 {dimension_numbers = #tpu.dot_dimension_numbers<[1], [0], [0], [1], [0, 0, 1, 1], [], []>} : vector<8x32xbf16>, vector<32x128xbf16>, vector<8x128xf32> -> vector<8x128xf32>
    %81 = arith.addf %78, %80 : vector<8x128xf32>
    %82 = math.tanh %81 : vector<8x128xf32>
    %83 = vector.extract_strided_slice %82 {offsets = [0, 0], sizes = [8, 32], strides = [1, 1]} : vector<8x128xf32> to vector<8x32xf32>
    %cst_35 = arith.constant 1.000000e+00 : f32
    %84 = vector.broadcast %cst_35 : f32 to vector<8x32xf32>
    %85 = arith.addf %83, %84 : vector<8x32xf32>
    %cst_36 = arith.constant 5.000000e-01 : f32
    %86 = vector.broadcast %cst_36 : f32 to vector<8x32xf32>
    %87 = arith.mulf %86, %85 : vector<8x32xf32>
    %88 = vector.extract_strided_slice %82 {offsets = [0, 32], sizes = [8, 32], strides = [1, 1]} : vector<8x128xf32> to vector<8x32xf32>
    %cst_37 = arith.constant 1.000000e+00 : f32
    %89 = vector.broadcast %cst_37 : f32 to vector<8x32xf32>
    %90 = arith.addf %88, %89 : vector<8x32xf32>
    %cst_38 = arith.constant 5.000000e-01 : f32
    %91 = vector.broadcast %cst_38 : f32 to vector<8x32xf32>
    %92 = arith.mulf %91, %90 : vector<8x32xf32>
    %93 = vector.extract_strided_slice %82 {offsets = [0, 64], sizes = [8, 32], strides = [1, 1]} : vector<8x128xf32> to vector<8x32xf32>
    %94 = vector.extract_strided_slice %82 {offsets = [0, 96], sizes = [8, 32], strides = [1, 1]} : vector<8x128xf32> to vector<8x32xf32>
    %cst_39 = arith.constant 1.000000e+00 : f32
    %95 = vector.broadcast %cst_39 : f32 to vector<8x32xf32>
    %96 = arith.addf %94, %95 : vector<8x32xf32>
    %cst_40 = arith.constant 5.000000e-01 : f32
    %97 = vector.broadcast %cst_40 : f32 to vector<8x32xf32>
    %98 = arith.mulf %97, %96 : vector<8x32xf32>
    %99 = arith.mulf %92, %70 : vector<8x32xf32>
    %100 = arith.mulf %87, %93 : vector<8x32xf32>
    %101 = arith.addf %99, %100 : vector<8x32xf32>
    %102 = math.tanh %101 : vector<8x32xf32>
    %103 = arith.mulf %98, %102 : vector<8x32xf32>
    %104 = arith.index_cast %76 : i32 to index
    %c0_41 = arith.constant 0 : index
    %105 = vector.load %arg9[%104, %c0_41] : memref<64x64xf32, #tpu.memory_space<vmem>>, vector<8x32xf32>
    tpu.vector_store %arg9[%104, %c0_41], %103 {strides = array<i32>} : memref<64x64xf32, #tpu.memory_space<vmem>>, vector<8x32xf32>,
    %c3_i32 = arith.constant 3 : i32
    %c8_i32_42 = arith.constant 8 : i32
    %106 = arith.muli %c3_i32, %c8_i32_42 : i32
    %107 = tpu.assume_multiple %106, 8 : i32
    %108 = arith.index_cast %107 : i32 to index
    %c0_43 = arith.constant 0 : index
    %109 = vector.load %arg8[%108, %c0_43] : memref<64x128xf32, #tpu.memory_space<vmem>>, vector<8x128xf32>
    %110 = arith.truncf %103 : vector<8x32xf32> to vector<8x32xbf16>
    %cst_44 = arith.constant dense<0.000000e+00> : vector<8x128xf32>
    %111 = tpu.matmul %110, %10, %cst_44 {dimension_numbers = #tpu.dot_dimension_numbers<[1], [0], [0], [1], [0, 0, 1, 1], [], []>} : vector<8x32xbf16>, vector<32x128xbf16>, vector<8x128xf32> -> vector<8x128xf32>
    %112 = arith.addf %109, %111 : vector<8x128xf32>
    %113 = math.tanh %112 : vector<8x128xf32>
    %114 = vector.extract_strided_slice %113 {offsets = [0, 0], sizes = [8, 32], strides = [1, 1]} : vector<8x128xf32> to vector<8x32xf32>
    %cst_45 = arith.constant 1.000000e+00 : f32
    %115 = vector.broadcast %cst_45 : f32 to vector<8x32xf32>
    %116 = arith.addf %114, %115 : vector<8x32xf32>
    %cst_46 = arith.constant 5.000000e-01 : f32
    %117 = vector.broadcast %cst_46 : f32 to vector<8x32xf32>
    %118 = arith.mulf %117, %116 : vector<8x32xf32>
    %119 = vector.extract_strided_slice %113 {offsets = [0, 32], sizes = [8, 32], strides = [1, 1]} : vector<8x128xf32> to vector<8x32xf32>
    %cst_47 = arith.constant 1.000000e+00 : f32
    %120 = vector.broadcast %cst_47 : f32 to vector<8x32xf32>
    %121 = arith.addf %119, %120 : vector<8x32xf32>
    %cst_48 = arith.constant 5.000000e-01 : f32
    %122 = vector.broadcast %cst_48 : f32 to vector<8x32xf32>
    %123 = arith.mulf %122, %121 : vector<8x32xf32>
    %124 = vector.extract_strided_slice %113 {offsets = [0, 64], sizes = [8, 32], strides = [1, 1]} : vector<8x128xf32> to vector<8x32xf32>
    %125 = vector.extract_strided_slice %113 {offsets = [0, 96], sizes = [8, 32], strides = [1, 1]} : vector<8x128xf32> to vector<8x32xf32>
    %cst_49 = arith.constant 1.000000e+00 : f32
    %126 = vector.broadcast %cst_49 : f32 to vector<8x32xf32>
    %127 = arith.addf %125, %126 : vector<8x32xf32>
    %cst_50 = arith.constant 5.000000e-01 : f32
    %128 = vector.broadcast %cst_50 : f32 to vector<8x32xf32>
    %129 = arith.mulf %128, %127 : vector<8x32xf32>
    %130 = arith.mulf %123, %101 : vector<8x32xf32>
    %131 = arith.mulf %118, %124 : vector<8x32xf32>
    %132 = arith.addf %130, %131 : vector<8x32xf32>
    %133 = math.tanh %132 : vector<8x32xf32>
    %134 = arith.mulf %129, %133 : vector<8x32xf32>
    %135 = arith.index_cast %107 : i32 to index
    %c0_51 = arith.constant 0 : index
    %136 = vector.load %arg9[%135, %c0_51] : memref<64x64xf32, #tpu.memory_space<vmem>>, vector<8x32xf32>
    tpu.vector_store %arg9[%135, %c0_51], %134 {strides = array<i32>} : memref<64x64xf32, #tpu.memory_space<vmem>>, vector<8x32xf32>,
    %c4_i32 = arith.constant 4 : i32
    %c8_i32_52 = arith.constant 8 : i32
    %137 = arith.muli %c4_i32, %c8_i32_52 : i32
    %138 = tpu.assume_multiple %137, 8 : i32
    %139 = arith.index_cast %138 : i32 to index
    %c0_53 = arith.constant 0 : index
    %140 = vector.load %arg8[%139, %c0_53] : memref<64x128xf32, #tpu.memory_space<vmem>>, vector<8x128xf32>
    %141 = arith.truncf %134 : vector<8x32xf32> to vector<8x32xbf16>
    %cst_54 = arith.constant dense<0.000000e+00> : vector<8x128xf32>
    %142 = tpu.matmul %141, %10, %cst_54 {dimension_numbers = #tpu.dot_dimension_numbers<[1], [0], [0], [1], [0, 0, 1, 1], [], []>} : vector<8x32xbf16>, vector<32x128xbf16>, vector<8x128xf32> -> vector<8x128xf32>
    %143 = arith.addf %140, %142 : vector<8x128xf32>
    %144 = math.tanh %143 : vector<8x128xf32>
    %145 = vector.extract_strided_slice %144 {offsets = [0, 0], sizes = [8, 32], strides = [1, 1]} : vector<8x128xf32> to vector<8x32xf32>
    %cst_55 = arith.constant 1.000000e+00 : f32
    %146 = vector.broadcast %cst_55 : f32 to vector<8x32xf32>
    %147 = arith.addf %145, %146 : vector<8x32xf32>
    %cst_56 = arith.constant 5.000000e-01 : f32
    %148 = vector.broadcast %cst_56 : f32 to vector<8x32xf32>
    %149 = arith.mulf %148, %147 : vector<8x32xf32>
    %150 = vector.extract_strided_slice %144 {offsets = [0, 32], sizes = [8, 32], strides = [1, 1]} : vector<8x128xf32> to vector<8x32xf32>
    %cst_57 = arith.constant 1.000000e+00 : f32
    %151 = vector.broadcast %cst_57 : f32 to vector<8x32xf32>
    %152 = arith.addf %150, %151 : vector<8x32xf32>
    %cst_58 = arith.constant 5.000000e-01 : f32
    %153 = vector.broadcast %cst_58 : f32 to vector<8x32xf32>
    %154 = arith.mulf %153, %152 : vector<8x32xf32>
    %155 = vector.extract_strided_slice %144 {offsets = [0, 64], sizes = [8, 32], strides = [1, 1]} : vector<8x128xf32> to vector<8x32xf32>
    %156 = vector.extract_strided_slice %144 {offsets = [0, 96], sizes = [8, 32], strides = [1, 1]} : vector<8x128xf32> to vector<8x32xf32>
    %cst_59 = arith.constant 1.000000e+00 : f32
    %157 = vector.broadcast %cst_59 : f32 to vector<8x32xf32>
    %158 = arith.addf %156, %157 : vector<8x32xf32>
    %cst_60 = arith.constant 5.000000e-01 : f32
    %159 = vector.broadcast %cst_60 : f32 to vector<8x32xf32>
    %160 = arith.mulf %159, %158 : vector<8x32xf32>
    %161 = arith.mulf %154, %132 : vector<8x32xf32>
    %162 = arith.mulf %149, %155 : vector<8x32xf32>
    %163 = arith.addf %161, %162 : vector<8x32xf32>
    %164 = math.tanh %163 : vector<8x32xf32>
    %165 = arith.mulf %160, %164 : vector<8x32xf32>
    %166 = arith.index_cast %138 : i32 to index
    %c0_61 = arith.constant 0 : index
    %167 = vector.load %arg9[%166, %c0_61] : memref<64x64xf32, #tpu.memory_space<vmem>>, vector<8x32xf32>
    tpu.vector_store %arg9[%166, %c0_61], %165 {strides = array<i32>} : memref<64x64xf32, #tpu.memory_space<vmem>>, vector<8x32xf32>,
    %c5_i32 = arith.constant 5 : i32
    %c8_i32_62 = arith.constant 8 : i32
    %168 = arith.muli %c5_i32, %c8_i32_62 : i32
    %169 = tpu.assume_multiple %168, 8 : i32
    %170 = arith.index_cast %169 : i32 to index
    %c0_63 = arith.constant 0 : index
    %171 = vector.load %arg8[%170, %c0_63] : memref<64x128xf32, #tpu.memory_space<vmem>>, vector<8x128xf32>
    %172 = arith.truncf %165 : vector<8x32xf32> to vector<8x32xbf16>
    %cst_64 = arith.constant dense<0.000000e+00> : vector<8x128xf32>
    %173 = tpu.matmul %172, %10, %cst_64 {dimension_numbers = #tpu.dot_dimension_numbers<[1], [0], [0], [1], [0, 0, 1, 1], [], []>} : vector<8x32xbf16>, vector<32x128xbf16>, vector<8x128xf32> -> vector<8x128xf32>
    %174 = arith.addf %171, %173 : vector<8x128xf32>
    %175 = math.tanh %174 : vector<8x128xf32>
    %176 = vector.extract_strided_slice %175 {offsets = [0, 0], sizes = [8, 32], strides = [1, 1]} : vector<8x128xf32> to vector<8x32xf32>
    %cst_65 = arith.constant 1.000000e+00 : f32
    %177 = vector.broadcast %cst_65 : f32 to vector<8x32xf32>
    %178 = arith.addf %176, %177 : vector<8x32xf32>
    %cst_66 = arith.constant 5.000000e-01 : f32
    %179 = vector.broadcast %cst_66 : f32 to vector<8x32xf32>
    %180 = arith.mulf %179, %178 : vector<8x32xf32>
    %181 = vector.extract_strided_slice %175 {offsets = [0, 32], sizes = [8, 32], strides = [1, 1]} : vector<8x128xf32> to vector<8x32xf32>
    %cst_67 = arith.constant 1.000000e+00 : f32
    %182 = vector.broadcast %cst_67 : f32 to vector<8x32xf32>
    %183 = arith.addf %181, %182 : vector<8x32xf32>
    %cst_68 = arith.constant 5.000000e-01 : f32
    %184 = vector.broadcast %cst_68 : f32 to vector<8x32xf32>
    %185 = arith.mulf %184, %183 : vector<8x32xf32>
    %186 = vector.extract_strided_slice %175 {offsets = [0, 64], sizes = [8, 32], strides = [1, 1]} : vector<8x128xf32> to vector<8x32xf32>
    %187 = vector.extract_strided_slice %175 {offsets = [0, 96], sizes = [8, 32], strides = [1, 1]} : vector<8x128xf32> to vector<8x32xf32>
    %cst_69 = arith.constant 1.000000e+00 : f32
    %188 = vector.broadcast %cst_69 : f32 to vector<8x32xf32>
    %189 = arith.addf %187, %188 : vector<8x32xf32>
    %cst_70 = arith.constant 5.000000e-01 : f32
    %190 = vector.broadcast %cst_70 : f32 to vector<8x32xf32>
    %191 = arith.mulf %190, %189 : vector<8x32xf32>
    %192 = arith.mulf %185, %163 : vector<8x32xf32>
    %193 = arith.mulf %180, %186 : vector<8x32xf32>
    %194 = arith.addf %192, %193 : vector<8x32xf32>
    %195 = math.tanh %194 : vector<8x32xf32>
    %196 = arith.mulf %191, %195 : vector<8x32xf32>
    %197 = arith.index_cast %169 : i32 to index
    %c0_71 = arith.constant 0 : index
    %198 = vector.load %arg9[%197, %c0_71] : memref<64x64xf32, #tpu.memory_space<vmem>>, vector<8x32xf32>
    tpu.vector_store %arg9[%197, %c0_71], %196 {strides = array<i32>} : memref<64x64xf32, #tpu.memory_space<vmem>>, vector<8x32xf32>,
    %c6_i32 = arith.constant 6 : i32
    %c8_i32_72 = arith.constant 8 : i32
    %199 = arith.muli %c6_i32, %c8_i32_72 : i32
    %200 = tpu.assume_multiple %199, 8 : i32
    %201 = arith.index_cast %200 : i32 to index
    %c0_73 = arith.constant 0 : index
    %202 = vector.load %arg8[%201, %c0_73] : memref<64x128xf32, #tpu.memory_space<vmem>>, vector<8x128xf32>
    %203 = arith.truncf %196 : vector<8x32xf32> to vector<8x32xbf16>
    %cst_74 = arith.constant dense<0.000000e+00> : vector<8x128xf32>
    %204 = tpu.matmul %203, %10, %cst_74 {dimension_numbers = #tpu.dot_dimension_numbers<[1], [0], [0], [1], [0, 0, 1, 1], [], []>} : vector<8x32xbf16>, vector<32x128xbf16>, vector<8x128xf32> -> vector<8x128xf32>
    %205 = arith.addf %202, %204 : vector<8x128xf32>
    %206 = math.tanh %205 : vector<8x128xf32>
    %207 = vector.extract_strided_slice %206 {offsets = [0, 0], sizes = [8, 32], strides = [1, 1]} : vector<8x128xf32> to vector<8x32xf32>
    %cst_75 = arith.constant 1.000000e+00 : f32
    %208 = vector.broadcast %cst_75 : f32 to vector<8x32xf32>
    %209 = arith.addf %207, %208 : vector<8x32xf32>
    %cst_76 = arith.constant 5.000000e-01 : f32
    %210 = vector.broadcast %cst_76 : f32 to vector<8x32xf32>
    %211 = arith.mulf %210, %209 : vector<8x32xf32>
    %212 = vector.extract_strided_slice %206 {offsets = [0, 32], sizes = [8, 32], strides = [1, 1]} : vector<8x128xf32> to vector<8x32xf32>
    %cst_77 = arith.constant 1.000000e+00 : f32
    %213 = vector.broadcast %cst_77 : f32 to vector<8x32xf32>
    %214 = arith.addf %212, %213 : vector<8x32xf32>
    %cst_78 = arith.constant 5.000000e-01 : f32
    %215 = vector.broadcast %cst_78 : f32 to vector<8x32xf32>
    %216 = arith.mulf %215, %214 : vector<8x32xf32>
    %217 = vector.extract_strided_slice %206 {offsets = [0, 64], sizes = [8, 32], strides = [1, 1]} : vector<8x128xf32> to vector<8x32xf32>
    %218 = vector.extract_strided_slice %206 {offsets = [0, 96], sizes = [8, 32], strides = [1, 1]} : vector<8x128xf32> to vector<8x32xf32>
    %cst_79 = arith.constant 1.000000e+00 : f32
    %219 = vector.broadcast %cst_79 : f32 to vector<8x32xf32>
    %220 = arith.addf %218, %219 : vector<8x32xf32>
    %cst_80 = arith.constant 5.000000e-01 : f32
    %221 = vector.broadcast %cst_80 : f32 to vector<8x32xf32>
    %222 = arith.mulf %221, %220 : vector<8x32xf32>
    %223 = arith.mulf %216, %194 : vector<8x32xf32>
    %224 = arith.mulf %211, %217 : vector<8x32xf32>
    %225 = arith.addf %223, %224 : vector<8x32xf32>
    %226 = math.tanh %225 : vector<8x32xf32>
    %227 = arith.mulf %222, %226 : vector<8x32xf32>
    %228 = arith.index_cast %200 : i32 to index
    %c0_81 = arith.constant 0 : index
    %229 = vector.load %arg9[%228, %c0_81] : memref<64x64xf32, #tpu.memory_space<vmem>>, vector<8x32xf32>
    tpu.vector_store %arg9[%228, %c0_81], %227 {strides = array<i32>} : memref<64x64xf32, #tpu.memory_space<vmem>>, vector<8x32xf32>,
    %c7_i32 = arith.constant 7 : i32
    %c8_i32_82 = arith.constant 8 : i32
    %230 = arith.muli %c7_i32, %c8_i32_82 : i32
    %231 = tpu.assume_multiple %230, 8 : i32
    %232 = arith.index_cast %231 : i32 to index
    %c0_83 = arith.constant 0 : index
    %233 = vector.load %arg8[%232, %c0_83] : memref<64x128xf32, #tpu.memory_space<vmem>>, vector<8x128xf32>
    %234 = arith.truncf %227 : vector<8x32xf32> to vector<8x32xbf16>
    %cst_84 = arith.constant dense<0.000000e+00> : vector<8x128xf32>
    %235 = tpu.matmul %234, %10, %cst_84 {dimension_numbers = #tpu.dot_dimension_numbers<[1], [0], [0], [1], [0, 0, 1, 1], [], []>} : vector<8x32xbf16>, vector<32x128xbf16>, vector<8x128xf32> -> vector<8x128xf32>
    %236 = arith.addf %233, %235 : vector<8x128xf32>
    %237 = math.tanh %236 : vector<8x128xf32>
    %238 = vector.extract_strided_slice %237 {offsets = [0, 0], sizes = [8, 32], strides = [1, 1]} : vector<8x128xf32> to vector<8x32xf32>
    %cst_85 = arith.constant 1.000000e+00 : f32
    %239 = vector.broadcast %cst_85 : f32 to vector<8x32xf32>
    %240 = arith.addf %238, %239 : vector<8x32xf32>
    %cst_86 = arith.constant 5.000000e-01 : f32
    %241 = vector.broadcast %cst_86 : f32 to vector<8x32xf32>
    %242 = arith.mulf %241, %240 : vector<8x32xf32>
    %243 = vector.extract_strided_slice %237 {offsets = [0, 32], sizes = [8, 32], strides = [1, 1]} : vector<8x128xf32> to vector<8x32xf32>
    %cst_87 = arith.constant 1.000000e+00 : f32
    %244 = vector.broadcast %cst_87 : f32 to vector<8x32xf32>
    %245 = arith.addf %243, %244 : vector<8x32xf32>
    %cst_88 = arith.constant 5.000000e-01 : f32
    %246 = vector.broadcast %cst_88 : f32 to vector<8x32xf32>
    %247 = arith.mulf %246, %245 : vector<8x32xf32>
    %248 = vector.extract_strided_slice %237 {offsets = [0, 64], sizes = [8, 32], strides = [1, 1]} : vector<8x128xf32> to vector<8x32xf32>
    %249 = vector.extract_strided_slice %237 {offsets = [0, 96], sizes = [8, 32], strides = [1, 1]} : vector<8x128xf32> to vector<8x32xf32>
    %cst_89 = arith.constant 1.000000e+00 : f32
    %250 = vector.broadcast %cst_89 : f32 to vector<8x32xf32>
    %251 = arith.addf %249, %250 : vector<8x32xf32>
    %cst_90 = arith.constant 5.000000e-01 : f32
    %252 = vector.broadcast %cst_90 : f32 to vector<8x32xf32>
    %253 = arith.mulf %252, %251 : vector<8x32xf32>
    %254 = arith.mulf %247, %225 : vector<8x32xf32>
    %255 = arith.mulf %242, %248 : vector<8x32xf32>
    %256 = arith.addf %254, %255 : vector<8x32xf32>
    %257 = math.tanh %256 : vector<8x32xf32>
    %258 = arith.mulf %253, %257 : vector<8x32xf32>
    %259 = arith.index_cast %231 : i32 to index
    %c0_91 = arith.constant 0 : index
    %260 = vector.load %arg9[%259, %c0_91] : memref<64x64xf32, #tpu.memory_space<vmem>>, vector<8x32xf32>
    tpu.vector_store %arg9[%259, %c0_91], %258 {strides = array<i32>} : memref<64x64xf32, #tpu.memory_space<vmem>>, vector<8x32xf32>,
    %c8_i32_92 = arith.constant 8 : i32
    %c0_93 = arith.constant 0 : index
    %c0_94 = arith.constant 0 : index
    %261 = vector.load %arg9[%c0_93, %c0_94] : memref<64x64xf32, #tpu.memory_space<vmem>>, vector<64x64xf32>
    %262 = arith.truncf %261 : vector<64x64xf32> to vector<64x64xbf16>
    %c0_95 = arith.constant 0 : index
    %c0_96 = arith.constant 0 : index
    %263 = vector.load %arg5[%c0_95, %c0_96] : memref<64x128xbf16, #tpu.memory_space<vmem>>, vector<64x128xbf16>
    %cst_97 = arith.constant dense<0.000000e+00> : vector<64x128xf32>
    %264 = tpu.matmul %262, %263, %cst_97 {dimension_numbers = #tpu.dot_dimension_numbers<[1], [0], [0], [1], [0, 0, 1, 1], [], []>} : vector<64x64xbf16>, vector<64x128xbf16>, vector<64x128xf32> -> vector<64x128xf32>
    %c0_98 = arith.constant 0 : index
    %c0_99 = arith.constant 0 : index
    %265 = vector.load %arg6[%c0_98, %c0_99] : memref<1x128xf32, #tpu.memory_space<vmem>>, vector<1x128xf32>
    %266 = vector.broadcast %265 : vector<1x128xf32> to vector<64x128xf32>
    %267 = arith.addf %264, %266 : vector<64x128xf32>
    %268 = math.tanh %267 : vector<64x128xf32>
    %c0_100 = arith.constant 0 : index
    %c0_101 = arith.constant 0 : index
    %c0_102 = arith.constant 0 : index
    %269 = vector.load %arg7[%c0_100, %c0_101, %c0_102] : memref<1x64x128xf32, #tpu.memory_space<vmem>>, vector<1x64x128xf32>
    %270 = vector.shape_cast %269 : vector<1x64x128xf32> to vector<64x128xf32>
    %271 = vector.shape_cast %268 : vector<64x128xf32> to vector<1x64x128xf32>
    tpu.vector_store %arg7[%c0_100, %c0_101, %c0_102], %271 {strides = array<i32>} : memref<1x64x128xf32, #tpu.memory_space<vmem>>, vector<1x64x128xf32>,
    return
  }
  func.func @transform_0(%arg0: i32) -> (i32, i32, i32) {
    %c0_i32 = arith.constant 0 : i32
    %c0_i32_0 = arith.constant 0 : i32
    %c0_i32_1 = arith.constant 0 : i32
    return %arg0, %c0_i32, %c0_i32_0 : i32, i32, i32
  }
  func.func @transform_1(%arg0: i32) -> (i32, i32) {
    %c0_i32 = arith.constant 0 : i32
    %c0_i32_0 = arith.constant 0 : i32
    %c0_i32_1 = arith.constant 0 : i32
    return %c0_i32, %c0_i32_0 : i32, i32
  }
  func.func @transform_2(%arg0: i32) -> (i32, i32) {
    %c0_i32 = arith.constant 0 : i32
    %c0_i32_0 = arith.constant 0 : i32
    %c0_i32_1 = arith.constant 0 : i32
    return %c0_i32, %c0_i32_0 : i32, i32
  }
  func.func @transform_3(%arg0: i32) -> (i32, i32) {
    %c0_i32 = arith.constant 0 : i32
    %c0_i32_0 = arith.constant 0 : i32
    %c0_i32_1 = arith.constant 0 : i32
    return %c0_i32, %c0_i32_0 : i32, i32
  }
  func.func @transform_4(%arg0: i32) -> (i32, i32) {
    %c0_i32 = arith.constant 0 : i32
    %c0_i32_0 = arith.constant 0 : i32
    %c0_i32_1 = arith.constant 0 : i32
    return %c0_i32, %c0_i32_0 : i32, i32
  }
  func.func @transform_5(%arg0: i32) -> (i32, i32) {
    %c0_i32 = arith.constant 0 : i32
    %c0_i32_0 = arith.constant 0 : i32
    %c0_i32_1 = arith.constant 0 : i32
    return %c0_i32, %c0_i32_0 : i32, i32
  }
  func.func @transform_6(%arg0: i32) -> (i32, i32, i32) {
    %c0_i32 = arith.constant 0 : i32
    %c0_i32_0 = arith.constant 0 : i32
    %c0_i32_1 = arith.constant 0 : i32
    return %arg0, %c0_i32, %c0_i32_0 : i32, i32, i32
  }
}

</mosaic_0001>

<bundles_post_ra>
// kernel: tpu_custom_call.1
= control target key start
LH: loop header
LB: loop body
LE: loop exit
PB: predicated region body
PF: predicated region fallthrough
CT: control target
= control target key end

     0   :  { %11 = vsyncpa [#allocation5], 0  ;;  %s1607_s0 = inlined_call_operand.vmem [shape: bf16[1,64,32], index: 0, kind: input, shape index: {}]   ;;  %s1608_s1 = inlined_call_operand.vmem [shape: bf16[32,128], index: 1, kind: input, shape index: {}]   ;;  %s1609_s2 = inlined_call_operand.hbm [shape: bf16[32,128], index: 2, kind: input, shape index: {}]   ;;  %s1610_s3 = inlined_call_operand.vmem [shape: f32[1,128], index: 3, kind: input, shape index: {}]   ;;  %s1611_s4 = inlined_call_operand.vmem [shape: bf16[64,128], index: 4, kind: input, shape index: {}]   ;;  %s1612_s5 = inlined_call_operand.vmem [shape: f32[1,128], index: 5, kind: input, shape index: {}]   ;;  %s1613_s6 = inlined_call_operand.hbm [shape: f32[1,64,128], index: 6, kind: output, shape index: {}]  }
   0x1   :  { %12 = vsyncpa [#allocation6], 0  ;;  %s1306_s21 = smov [#allocation4]   ;;  %s1258_s25 = scalar_lea.hbm %s1609_s2, 256 }
   0x2   :  { %s22_s22 = sshll.u32 %s1306_s21, 4  ;;  %p1259_p0 = scmp.ne.s32.totalorder %s1609_s2, %s1258_s25  ;;  %s23_s22 = int_to_ptr.vmem [resolvable:$true] %s22_s22 }
   0x3   :  { %p1262_p1 = scmp.lt.u32.totalorder %s1258_s25, %s1609_s2 }
   0x5   :  { %p1264_p2 = pnand %p1262_p1, %p1259_p0 }
   0x7   :  { %1267 = shalt.err (!%p1264_p2)
}
   0x8   :  { %s1268_s30 = scalar_lea.vmem %s23_s22, 256  ;;  %p1273_p4 = scmp.lt.s32.totalorder %s23_s22, %s23_s22 }
   0x9   :  { %p1269_p3 = scmp.ne.s32.totalorder %s23_s22, %s1268_s30  ;;  %p1274_p5 = scmp.lt.s32.totalorder %s1268_s30, %s1268_s30 }
   0xb   :  { %p1275_p6 = por %p1274_p5, %p1273_p4 }
   0xd   :  { %p1276_p7 = pnand %p1275_p6, %p1269_p3 }
   0xf   :  { %1279 = shalt.err (!%p1276_p7)
}
  0x10   :  { %s1307_s7 = smov 64   ;;  %s1308_s8 = smov 4  }
  0x11   :  { %28 = dma.hbm_to_vmem [thread:$0]  %s1609_s2, 256, %s23_s22, [#allocation5], %s1307_s7, %s1307_s7, %s1308_s8  }
  0x12   :  { %1302 = dma.done.wait [#allocation5], 256  }
  0x13   :  { %1303 = vsyncadd [#allocation5], 4294967040  ;;  %v1309_v0 = vmov 0.0   ;;  %vm1310_vm0 = vmmov 0   ;;  %v1194_v1 = vld [vmem:[%s1608_s1] sm:$0xff]   ;;  %v1195_v2 = vld [vmem:[%s1608_s1 + $0x8] sm:$0xff]  }
  0x14   :  { %1100 = vmatprep.subr.bf16.mxu0 %v1309_v0  ;;  %1104 = vmatprep.mubr.msk.bf16.mxu0 %vm1310_vm0, %v1309_v0  ;;  %v1377_v3 = vld [vmem:[%s1607_s0] sm:$0xff]   ;;  %vm90_vm1 = vcmask 261120   ;;  %v1382_v4 = vld [vmem:[%s1607_s0 + $0x8] sm:$0xff]   ;;  %v1389_v6 = vld [vmem:[%s1607_s0 + $0x10] sm:$0xff]   ;;  %v1311_v9 = vmov 0   ;;  %vm216_vm2 = vcmask 523520  }
  0x15   :  { %1072 = vmatprep.subr.bf16.mxu1 %v1194_v1  ;;  %v1384_v5 = vld [vmem:[#allocation4] sm:$0xff]   ;;  %1076 = vmatprep.mubr.msk.bf16.mxu1 %vm90_vm1, %v1377_v3  ;;  %v1393_v7 = vld [vmem:[#allocation4 + $0x8] sm:$0xff]   ;;  %v1408_v8 = vld [vmem:[%s1607_s0 + $0x18] sm:$0xff]   ;;  %vm894_vm3 = vcmask 523264  }
  0x16   :  { %1073 = vmatpush3.bf16.msra.mxu1 %v1194_v1  ;;  %1101 = vmatpush3.bf16.msra.mxu0 %v1384_v5  ;;  %v1005_v10 = vld [vmem:[%s1610_s3] ss:$0 sm:$0xff]  ;;  %s1312_s3 = smov 32  }
  0x17   :  { %1074 = vmatprep.subr.bf16.mxu1 %v1195_v2  ;;  %1102 = vmatprep.subr.bf16.mxu0 %v1309_v0 }
  0x1a   :  { %1075 = vmatpush3.bf16.msra.mxu1 %v1195_v2  ;;  %1103 = vmatpush3.bf16.msra.mxu0 %v1393_v7 }
  0x1b   :  { %1084 = vmatprep.subr.bf16.mxu1 %v1309_v0  ;;  %1116 = vmatprep.subr.bf16.mxu0 %v1309_v0 }
  0x1d   :  { %1077 = vmatmul.mubr.msk.bf16.vlgmr.msra.gmra.mrb[0].mxu1 %vm90_vm1, %v1382_v4 }
  0x1e   :  { %1085 = vmatpush3.bf16.msra.mxu1 %v1384_v5  ;;  %1080 = vmatprep.mubr.msk.bf16.mxu1 %vm90_vm1, %v1389_v6 }
  0x1f   :  { %1086 = vmatprep.subr.bf16.mxu1 %v1309_v0 }
  0x22   :  { %1087 = vmatpush3.bf16.msra.mxu1 %v1393_v7 }
  0x23   :  { %1092 = vmatprep.subr.bf16.mxu1 %v1309_v0 }
  0x25   :  { %1081 = vmatmul.mubr.msk.bf16.gmra.mrb[4].mxu1 %vm90_vm1, %v1408_v8 }
  0x26   :  { %1088 = vmatprep.mubr.msk.bf16.mxu1 %vm1310_vm0, %v1309_v0 }
  0x2d   :  { %1089 = vmatmul.mubr.bf16.vlgmr.msra.gmra.mrb[8].mxu1 %v1311_v9 }
  0x2e   :  { %1093 = vmatpush3.bf16.msra.mxu1 %v1384_v5  ;;  %1096 = vmatprep.mubr.msk.bf16.mxu1 %vm1310_vm0, %v1309_v0 }
  0x2f   :  { %1094 = vmatprep.subr.bf16.mxu1 %v1309_v0 }
  0x32   :  { %1095 = vmatpush3.bf16.msra.mxu1 %v1393_v7 }
  0x33   :  { %1108 = vmatprep.subr.bf16.mxu1 %v1309_v0 }
  0xf0   :  { %v1078_v11 = vpop.f32.mrb[0].mxu1 }
  0xf1   :  { %v1426_v12 = vadd.f32 %v1078_v11, %v1005_v10  ;;  %v137_v13 = vpop.f32.mrb[1].mxu1 }
  0xf2   :  { %v1079_v14 = vpop.f32.mrb[2].mxu1  ;;  %v138_v26 = vadd.f32 %v1005_v10, %v137_v13 }
  0xf3   :  { %v1428_v15 = vadd.f32 %v1079_v14, %v1005_v10  ;;  %v140_v16 = vpop.f32.mrb[3].mxu1 }
  0xf4   :  { %v141_v17 = vadd.f32 %v1005_v10, %v140_v16 }
  0xf8   :  { %v1082_v18 = vpop.f32.mrb[4].mxu1 }
  0xf9   :  { %v1430_v19 = vadd.f32 %v1082_v18, %v1005_v10  ;;  %v153_v20 = vpop.f32.mrb[5].mxu1 }
  0xfa   :  { %v1432_v21 = vadd.f32 %v1005_v10, %v153_v20  ;;  %v1083_v22 = vpop.f32.mrb[6].mxu1 }
  0xfb   :  { %v1434_v23 = vadd.f32 %v1083_v22, %v1005_v10  ;;  %v156_v24 = vpop.f32.mrb[7].mxu1 }
  0xfc   :  { %v1436_v25 = vadd.f32 %v1005_v10, %v156_v24 }
 0x100   :  { %v279_v27 = vpop.f32.mrb[8].mxu1 }
 0x101   :  { %v285_v28 = vadd.f32 %v279_v27, %v138_v26  ;;  %v1090_v29 = vpop.f32.mrb[9].mxu1 }
 0x102   :  { %v282_v30 = vpop.f32.mrb[10].mxu1 }
 0x103   :  { %1210 = vtanh.f32 %v285_v28  ;;  %v1091_v31 = vpop.f32.mrb[11].mxu1 }
 0x10d   :  { %v1211_v32 = vpop.eup %1210 }
 0x10e   :  { %291 = vrot.lane.b32.xlu0 %v1211_v32, %s1307_s7  ;;  %v287_v33 = vadd.f32 1.0, %v1211_v32 }
 0x110   :  { %v288_v34 = vmul.f32 0.5, %v287_v33 }
 0x112   :  { %v289_v37 = vmul.f32 0.0, %v288_v34 }
 0x180   :  { %v292_v35 = vpop.permute.xlu0 %291 }
 0x181   :  { %v294_v36 = vmul.f32 %v292_v35, %v288_v34 }
 0x183   :  { %296 = vrot.lane.b32.xlu0 %v294_v36, %s1312_s3 }
 0x1f5   :  { %v297_v38 = vpop.permute.xlu0 %296 }
 0x1f6   :  { %v299_v39 = vadd.f32 %v297_v38, %v289_v37 }
 0x1f8   :  { %1212 = vtanh.f32 %v299_v39 }
 0x202   :  { %v1213_v40 = vpop.eup %1212 }
 0x203   :  { %302 = vrot.lane.b32.xlu1 %v1213_v40, %s1307_s7 }
 0x275   :  { %v303_v41 = vpop.permute.xlu1 %302 }
 0x276   :  { %v1441_v42 = vmul.f32 %v303_v41, %v288_v34 }
 0x278   :  { %v313_v43 = vpack.c.bf16 %v1441_v42, %v1441_v42 }
 0x27a   :  { %315 = vrot.lane.b32.xlu1 %v313_v43, %s1312_s3 }
 0x2ec   :  { %v316_v44 = vpop.permute.xlu1 %315 }
 0x2ed   :  { %1097 = vmatmul.mubr.msk.bf16.vlgmr.msra.gmra.mrb[12].mxu1 %vm90_vm1, %v316_v44 }
 0x2ee   :  { %1109 = vmatpush3.bf16.msra.mxu1 %v1384_v5  ;;  %1112 = vmatprep.mubr.msk.bf16.mxu1 %vm1310_vm0, %v1309_v0 }
 0x2ef   :  { %1110 = vmatprep.subr.bf16.mxu1 %v1309_v0 }
 0x2f2   :  { %1111 = vmatpush3.bf16.msra.mxu1 %v1393_v7 }
 0x2f3   :  { %1124 = vmatprep.subr.bf16.mxu1 %v1309_v0 }
 0x3c0   :  { %v354_v45 = vpop.f32.mrb[12].mxu1 }
 0x3c1   :  { %v360_v46 = vadd.f32 %v354_v45, %v141_v17  ;;  %v1098_v47 = vpop.f32.mrb[13].mxu1 }
 0x3c2   :  { %v357_v48 = vpop.f32.mrb[14].mxu1 }
 0x3c3   :  { %1214 = vtanh.f32 %v360_v46  ;;  %v1099_v49 = vpop.f32.mrb[15].mxu1 }
 0x3cd   :  { %v1215_v50 = vpop.eup %1214 }
 0x3ce   :  { %366 = vrot.lane.b32.xlu0 %v1215_v50, %s1307_s7  ;;  %v362_v51 = vadd.f32 1.0, %v1215_v50 }
 0x3d0   :  { %v363_v52 = vmul.f32 0.5, %v362_v51 }
 0x3d2   :  { %v364_v55 = vmul.f32 %v363_v52, %v299_v39 }
 0x440   :  { %v367_v53 = vpop.permute.xlu0 %366 }
 0x441   :  { %v369_v54 = vmul.f32 %v367_v53, %v363_v52 }
 0x443   :  { %371 = vrot.lane.b32.xlu1 %v369_v54, %s1312_s3 }
 0x4b5   :  { %v372_v56 = vpop.permute.xlu1 %371 }
 0x4b6   :  { %v374_v57 = vadd.f32 %v372_v56, %v364_v55 }
 0x4b8   :  { %1216 = vtanh.f32 %v374_v57 }
 0x4c2   :  { %v1217_v58 = vpop.eup %1216 }
 0x4c3   :  { %377 = vrot.lane.b32.xlu0 %v1217_v58, %s1307_s7 }
 0x535   :  { %v378_v59 = vpop.permute.xlu0 %377 }
 0x536   :  { %v1456_v60 = vmul.f32 %v378_v59, %v363_v52 }
 0x538   :  { %v389_v61 = vpack.c.bf16 %v1456_v60, %v1456_v60 }
 0x53a   :  { %391 = vrot.lane.b32.xlu1 %v389_v61, %s1312_s3 }
 0x5ac   :  { %v392_v62 = vpop.permute.xlu1 %391 }
 0x5ad   :  { %1105 = vmatmul.mubr.msk.bf16.vlgmr.msra.gmra.mrb[0].mxu0 %vm90_vm1, %v392_v62 }
 0x5ae   :  { %1117 = vmatpush3.bf16.msra.mxu0 %v1384_v5  ;;  %1120 = vmatprep.mubr.msk.bf16.mxu0 %vm1310_vm0, %v1309_v0 }
 0x5af   :  { %1118 = vmatprep.subr.bf16.mxu0 %v1309_v0 }
 0x5b2   :  { %1119 = vmatpush3.bf16.msra.mxu0 %v1393_v7 }
 0x5b3   :  { %1132 = vmatprep.subr.bf16.mxu0 %v1309_v0 }
 0x680   :  { %v430_v63 = vpop.f32.mrb[0].mxu0 }
 0x681   :  { %v436_v1 = vadd.f32 %v430_v63, %v1426_v12  ;;  %v1106_v2 = vpop.f32.mrb[1].mxu0 }
 0x682   :  { %v433_v9 = vpop.f32.mrb[2].mxu0 }
 0x683   :  { %1218 = vtanh.f32 %v436_v1  ;;  %v1107_v10 = vpop.f32.mrb[3].mxu0 }
 0x68d   :  { %v1219_v11 = vpop.eup %1218 }
 0x68e   :  { %442 = vrot.lane.b32.xlu0 %v1219_v11, %s1307_s7  ;;  %v438_v13 = vadd.f32 1.0, %v1219_v11 }
 0x690   :  { %v439_v14 = vmul.f32 0.5, %v438_v13 }
 0x692   :  { %v440_v18 = vmul.f32 %v439_v14, %v374_v57 }
 0x700   :  { %v443_v16 = vpop.permute.xlu0 %442 }
 0x701   :  { %v445_v17 = vmul.f32 %v443_v16, %v439_v14 }
 0x703   :  { %447 = vrot.lane.b32.xlu1 %v445_v17, %s1312_s3 }
 0x775   :  { %v448_v20 = vpop.permute.xlu1 %447 }
 0x776   :  { %v450_v22 = vadd.f32 %v448_v20, %v440_v18 }
 0x778   :  { %1220 = vtanh.f32 %v450_v22 }
 0x782   :  { %v1221_v24 = vpop.eup %1220 }
 0x783   :  { %453 = vrot.lane.b32.xlu0 %v1221_v24, %s1307_s7 }
 0x7f5   :  { %v454_v12 = vpop.permute.xlu0 %453 }
 0x7f6   :  { %v1472_v26 = vmul.f32 %v454_v12, %v439_v14 }
 0x7f8   :  { %v465_v27 = vpack.c.bf16 %v1472_v26, %v1472_v26 }
 0x7fa   :  { %467 = vrot.lane.b32.xlu1 %v465_v27, %s1312_s3 }
 0x86c   :  { %v468_v28 = vpop.permute.xlu1 %467 }
 0x86d   :  { %1113 = vmatmul.mubr.msk.bf16.vlgmr.msra.gmra.mrb[16].mxu1 %vm90_vm1, %v468_v28 }
 0x86e   :  { %1125 = vmatpush3.bf16.msra.mxu1 %v1384_v5  ;;  %1128 = vmatprep.mubr.msk.bf16.mxu1 %vm1310_vm0, %v1309_v0 }
 0x86f   :  { %1126 = vmatprep.subr.bf16.mxu1 %v1309_v0 }
 0x872   :  { %1127 = vmatpush3.bf16.msra.mxu1 %v1393_v7 }
 0x873   :  { %1140 = vmatprep.subr.bf16.mxu1 %v1309_v0 }
 0x940   :  { %v506_v29 = vpop.f32.mrb[16].mxu1 }
 0x941   :  { %v512_v30 = vadd.f32 %v506_v29, %v1428_v15  ;;  %v1114_v31 = vpop.f32.mrb[17].mxu1 }
 0x942   :  { %v509_v32 = vpop.f32.mrb[18].mxu1 }
 0x943   :  { %1222 = vtanh.f32 %v512_v30  ;;  %v1115_v33 = vpop.f32.mrb[19].mxu1 }
 0x94d   :  { %v1223_v34 = vpop.eup %1222 }
 0x94e   :  { %518 = vrot.lane.b32.xlu0 %v1223_v34, %s1307_s7  ;;  %v514_v35 = vadd.f32 1.0, %v1223_v34 }
 0x950   :  { %v515_v36 = vmul.f32 0.5, %v514_v35 }
 0x952   :  { %v516_v39 = vmul.f32 %v515_v36, %v450_v22 }
 0x9c0   :  { %v519_v37 = vpop.permute.xlu0 %518 }
 0x9c1   :  { %v521_v38 = vmul.f32 %v519_v37, %v515_v36 }
 0x9c3   :  { %523 = vrot.lane.b32.xlu1 %v521_v38, %s1312_s3 }
 0xa35   :  { %v524_v40 = vpop.permute.xlu1 %523 }
 0xa36   :  { %v526_v41 = vadd.f32 %v524_v40, %v516_v39 }
 0xa38   :  { %1224 = vtanh.f32 %v526_v41 }
 0xa42   :  { %v1225_v43 = vpop.eup %1224 }
 0xa43   :  { %529 = vrot.lane.b32.xlu0 %v1225_v43, %s1307_s7 }
 0xab5   :  { %v530_v15 = vpop.permute.xlu0 %529 }
 0xab6   :  { %v1488_v44 = vmul.f32 %v530_v15, %v515_v36 }
 0xab8   :  { %v541_v45 = vpack.c.bf16 %v1488_v44, %v1488_v44 }
 0xaba   :  { %543 = vrot.lane.b32.xlu1 %v541_v45, %s1312_s3 }
 0xb2c   :  { %v544_v46 = vpop.permute.xlu1 %543 }
 0xb2d   :  { %1121 = vmatmul.mubr.msk.bf16.vlgmr.msra.gmra.mrb[4].mxu0 %vm90_vm1, %v544_v46 }
 0xb2e   :  { %1133 = vmatpush3.bf16.msra.mxu0 %v1384_v5  ;;  %1136 = vmatprep.mubr.msk.bf16.mxu0 %vm1310_vm0, %v1309_v0 }
 0xb2f   :  { %1134 = vmatprep.subr.bf16.mxu0 %v1309_v0 }
 0xb32   :  { %1135 = vmatpush3.bf16.msra.mxu0 %v1393_v7 }
 0xc00   :  { %v582_v47 = vpop.f32.mrb[4].mxu0 }
 0xc01   :  { %v588_v48 = vadd.f32 %v582_v47, %v1432_v21  ;;  %v1122_v49 = vpop.f32.mrb[5].mxu0 }
 0xc02   :  { %v585_v50 = vpop.f32.mrb[6].mxu0 }
 0xc03   :  { %1226 = vtanh.f32 %v588_v48  ;;  %v1123_v51 = vpop.f32.mrb[7].mxu0 }
 0xc0d   :  { %v1227_v52 = vpop.eup %1226 }
 0xc0e   :  { %594 = vrot.lane.b32.xlu0 %v1227_v52, %s1307_s7  ;;  %v590_v53 = vadd.f32 1.0, %v1227_v52 }
 0xc10   :  { %v591_v54 = vmul.f32 0.5, %v590_v53  ;;  %v176_v53 = vunpack.c.l.bf16 %v1377_v3 }
 0xc12   :  { %v592_v57 = vmul.f32 %v591_v54, %v526_v41 }
 0xc80   :  { %v595_v55 = vpop.permute.xlu0 %594 }
 0xc81   :  { %v597_v56 = vmul.f32 %v595_v55, %v591_v54 }
 0xc83   :  { %599 = vrot.lane.b32.xlu1 %v597_v56, %s1312_s3 }
 0xcf5   :  { %v600_v58 = vpop.permute.xlu1 %599 }
 0xcf6   :  { %v602_v59 = vadd.f32 %v600_v58, %v592_v57 }
 0xcf8   :  { %1228 = vtanh.f32 %v602_v59 }
 0xd02   :  { %v1229_v61 = vpop.eup %1228 }
 0xd03   :  { %605 = vrot.lane.b32.xlu0 %v1229_v61, %s1307_s7 }
 0xd75   :  { %v606_v21 = vpop.permute.xlu0 %605 }
 0xd76   :  { %v1503_v62 = vmul.f32 %v606_v21, %v591_v54  ;;  %v177_v54 = vunpack.c.h.bf16 %v1377_v3 }
 0xd78   :  { %v617_v63 = vpack.c.bf16 %v1503_v62, %v1503_v62  ;;  %v1174_v58 = vpack.i.bf16 %v177_v54, %v176_v53 }
 0xd7a   :  { %619 = vrot.lane.b32.xlu1 %v617_v63, %s1312_s3 }
 0xdec   :  { %v620_v1 = vpop.permute.xlu1 %619 }
 0xded   :  { %1129 = vmatmul.mubr.msk.bf16.vlgmr.msra.gmra.mrb[20].mxu1 %vm90_vm1, %v620_v1 }
 0xdee   :  { %1141 = vmatpush3.bf16.msra.mxu1 %v1384_v5  ;;  %1144 = vmatprep.mubr.msk.bf16.mxu1 %vm1310_vm0, %v1309_v0 }
 0xdef   :  { %1142 = vmatprep.subr.bf16.mxu1 %v1309_v0 }
 0xdf2   :  { %1143 = vmatpush3.bf16.msra.mxu1 %v1393_v7 }
 0xec0   :  { %v658_v2 = vpop.f32.mrb[20].mxu1 }
 0xec1   :  { %v664_v9 = vadd.f32 %v658_v2, %v1436_v25  ;;  %v1130_v10 = vpop.f32.mrb[21].mxu1 }
 0xec2   :  { %v661_v11 = vpop.f32.mrb[22].mxu1  ;;  %v179_v10 = vunpack.c.h.bf16 %v1382_v4 }
 0xec3   :  { %1230 = vtanh.f32 %v664_v9  ;;  %v1131_v13 = vpop.f32.mrb[23].mxu1  ;;  %v178_v9 = vunpack.c.l.bf16 %v1382_v4  ;;  %v1205_v4 = vld [vmem:[%s1611_s4 + $0x18] sm:$0xff]  }
 0xecd   :  { %v1231_v14 = vpop.eup %1230 }
 0xece   :  { %670 = vrot.lane.b32.xlu0 %v1231_v14, %s1307_s7  ;;  %v666_v16 = vadd.f32 1.0, %v1231_v14  ;;  %v1204_v14 = vld [vmem:[%s1611_s4 + $0x10] sm:$0xff]  }
 0xed0   :  { %v667_v17 = vmul.f32 0.5, %v666_v16  ;;  %v1179_v16 = vpack.i.bf16 %v179_v10, %v178_v9 }
 0xed2   :  { %v668_v20 = vmul.f32 %v667_v17, %v602_v59  ;;  %v181_v59 = vunpack.c.h.bf16 %v1389_v6 }
 0xf40   :  { %v671_v5 = vpop.permute.xlu0 %670 }
 0xf41   :  { %v673_v18 = vmul.f32 %v671_v5, %v667_v17 }
 0xf43   :  { %675 = vrot.lane.b32.xlu1 %v673_v18, %s1312_s3 }
 0xfb5   :  { %v676_v0 = vpop.permute.xlu1 %675 }
 0xfb6   :  { %v678_v22 = vadd.f32 %v676_v0, %v668_v20  ;;  %v182_v0 = vunpack.c.l.bf16 %v1408_v8 }
 0xfb8   :  { %1232 = vtanh.f32 %v678_v22 }
 0xfc2   :  { %v1233_v7 = vpop.eup %1232 }
 0xfc3   :  { %681 = vrot.lane.b32.xlu0 %v1233_v7, %s1307_s7 }
0x1035   :  { %v682_v25 = vpop.permute.xlu0 %681 }
0x1036   :  { %v1518_v24 = vmul.f32 %v682_v25, %v667_v17 }
0x1038   :  { %v693_v12 = vpack.c.bf16 %v1518_v24, %v1518_v24 }
0x103a   :  { %695 = vrot.lane.b32.xlu1 %v693_v12, %s1312_s3 }
0x10ac   :  { %v696_v27 = vpop.permute.xlu1 %695 }
0x10ad   :  { %1137 = vmatmul.mubr.msk.bf16.vlgmr.msra.gmra.mrb[8].mxu0 %vm90_vm1, %v696_v27 }
0x1180   :  { %v734_v28 = vpop.f32.mrb[8].mxu0 }
0x1181   :  { %v740_v29 = vadd.f32 %v734_v28, %v1430_v19  ;;  %v1138_v30 = vpop.f32.mrb[9].mxu0 }
0x1182   :  { %v737_v31 = vpop.f32.mrb[10].mxu0 }
0x1183   :  { %1234 = vtanh.f32 %v740_v29  ;;  %v1139_v32 = vpop.f32.mrb[11].mxu0 }
0x118d   :  { %v1235_v33 = vpop.eup %1234 }
0x118e   :  { %746 = vrot.lane.b32.xlu0 %v1235_v33, %s1307_s7  ;;  %v742_v34 = vadd.f32 1.0, %v1235_v33 }
0x1190   :  { %v743_v35 = vmul.f32 0.5, %v742_v34 }
0x1192   :  { %v744_v38 = vmul.f32 %v743_v35, %v678_v22  ;;  %v183_v22 = vunpack.c.h.bf16 %v1408_v8 }
0x1194   :  { %v1189_v7 = vpack.i.bf16 %v183_v22, %v182_v0 }
0x1200   :  { %v747_v36 = vpop.permute.xlu0 %746 }
0x1201   :  { %v749_v37 = vmul.f32 %v747_v36, %v743_v35 }
0x1203   :  { %751 = vrot.lane.b32.xlu1 %v749_v37, %s1312_s3 }
0x1275   :  { %v752_v39 = vpop.permute.xlu1 %751 }
0x1276   :  { %v754_v40 = vadd.f32 %v752_v39, %v744_v38 }
0x1278   :  { %1236 = vtanh.f32 %v754_v40 }
0x1282   :  { %v1237_v41 = vpop.eup %1236 }
0x1283   :  { %757 = vrot.lane.b32.xlu0 %v1237_v41, %s1307_s7 }
0x12f5   :  { %v758_v19 = vpop.permute.xlu0 %757 }
0x12f6   :  { %v760_v43 = vmul.f32 %v758_v19, %v743_v35 }
0x12f8   :  { %v769_v15 = vpack.c.bf16 %v760_v43, %v760_v43 }
0x12fa   :  { %771 = vrot.lane.b32.xlu1 %v769_v15, %s1312_s3 }
0x136c   :  { %v772_v45 = vpop.permute.xlu1 %771 }
0x136d   :  { %1145 = vmatmul.mubr.msk.bf16.vlgmr.msra.gmra.mrb[24].mxu1 %vm90_vm1, %v772_v45 }
0x1440   :  { %v810_v46 = vpop.f32.mrb[24].mxu1 }
0x1441   :  { %v816_v47 = vadd.f32 %v810_v46, %v1434_v23  ;;  %v1146_v48 = vpop.f32.mrb[25].mxu1  ;;  %v180_v23 = vunpack.c.l.bf16 %v1389_v6  ;;  %v1202_v6 = vld [vmem:[%s1611_s4] sm:$0xff]  }
0x1442   :  { %v813_v49 = vpop.f32.mrb[26].mxu1  ;;  %1148 = vmatprep.subr.bf16.mxu0 %v1202_v6  ;;  %v1025_v46 = vld [vmem:[%s1612_s5] ss:$0 sm:$0xff]  ;;  %s1313_s5 = smov [#allocation7]  }
0x1443   :  { %1238 = vtanh.f32 %v816_v47  ;;  %v1147_v50 = vpop.f32.mrb[27].mxu1  ;;  %v1184_v61 = vpack.i.bf16 %v181_v59, %v180_v23  ;;  %1149 = vmatpush3.bf16.msra.mxu0 %v1202_v6 }
0x144d   :  { %v1239_v51 = vpop.eup %1238 }
0x144e   :  { %822 = vrot.lane.b32.xlu0 %v1239_v51, %s1307_s7  ;;  %v818_v52 = vadd.f32 1.0, %v1239_v51 }
0x1450   :  { %v819_v55 = vmul.f32 0.5, %v818_v52 }
0x1452   :  { %v820_v3 = vmul.f32 %v819_v55, %v754_v40 }
0x14c0   :  { %v823_v56 = vpop.permute.xlu0 %822 }
0x14c1   :  { %v825_v57 = vmul.f32 %v823_v56, %v819_v55 }
0x14c3   :  { %827 = vrot.lane.b32.xlu1 %v825_v57, %s1312_s3 }
0x14c7   :  { %1175 = vrot.lane.b32.xlu1 %v1174_v58, %s1312_s3 }
0x14cb   :  { %307 = vrot.lane.b32.xlu1 %v1441_v42, %s1312_s3 }
0x14cf   :  { %458 = vrot.lane.b32.xlu1 %v1472_v26, %s1312_s3 }
0x14d3   :  { %1185 = vrot.lane.b32.xlu1 %v1184_v61, %s1312_s3 }
0x14d7   :  { %610 = vrot.lane.b32.xlu1 %v1503_v62, %s1312_s3  ;;  %v1203_v62 = vld [vmem:[%s1611_s4 + $0x8] sm:$0xff]  }
0x14d8   :  { %1150 = vmatprep.subr.bf16.mxu0 %v1203_v62 }
0x14d9   :  { %1151 = vmatpush3.bf16.msra.mxu0 %v1203_v62 }
0x14da   :  { %1152 = vmatprep.subr.bf16.mxu0 %v1204_v14 }
0x14db   :  { %762 = vrot.lane.b32.xlu1 %v760_v43, %s1312_s3 }
0x14dd   :  { %1153 = vmatpush3.bf16.msra.mxu0 %v1204_v14 }
0x14de   :  { %1154 = vmatprep.subr.bf16.mxu0 %v1205_v4 }
0x14e1   :  { %1155 = vmatpush3.bf16.msra.mxu0 %v1205_v4 }
0x1535   :  { %v828_v21 = vpop.permute.xlu1 %827 }
0x1536   :  { %v830_v63 = vadd.f32 %v828_v21, %v820_v3 }
0x1538   :  { %1240 = vtanh.f32 %v830_v63 }
0x1539   :  { %v1176_v42 = vpop.permute.xlu1 %1175 }
0x153a   :  { %v1178_v1 = vunpack.i.h.bf16 %v1176_v42  ;;  %v1177_v2 = vunpack.i.l.bf16 %v1176_v42 }
0x153c   :  { %218 = vst.msk [vmem:[#allocation3 + $0x8] sm:$0xff] %vm216_vm2, %v1178_v1  ;;  %217 = vst.msk [vmem:[#allocation3] sm:$0xff] %vm216_vm2, %v1177_v2 }
0x153d   :  { %v308_v26 = vpop.permute.xlu1 %307 }
0x153e   :  { %310 = vst.msk [vmem:[#allocation3] sm:$0xff] %vm90_vm1, %v308_v26 }
0x1541   :  { %v459_v11 = vpop.permute.xlu1 %458 }
0x1542   :  { %v1241_v13 = vpop.eup %1240 }
0x1543   :  { %833 = vrot.lane.b32.xlu0 %v1241_v13, %s1307_s7  ;;  %s993_s7 = sshll.u32 %s1313_s5, 4  ;;  %s994_s7 = int_to_ptr.vmem [resolvable:$true] %s993_s7 }
0x1544   :  { %s1280_s8 = scalar_lea.vmem %s994_s7, 1024  ;;  %p1285_p9 = scmp.lt.s32.totalorder %s994_s7, %s994_s7 }
0x1545   :  { %v1186_v17 = vpop.permute.xlu1 %1185  ;;  %v843_v29 = vld [vmem:[#allocation3] sm:$0xff]  ;;  %p1281_p8 = scmp.ne.s32.totalorder %s994_s7, %s1280_s8  ;;  %p1286_p10 = scmp.lt.s32.totalorder %s1280_s8, %s1280_s8 }
0x1546   :  { %v1188_v5 = vunpack.i.h.bf16 %v1186_v17  ;;  %v1187_v18 = vunpack.i.l.bf16 %v1186_v17 }
0x1547   :  { %1180 = vrot.lane.b32.xlu0 %v1179_v16, %s1312_s3  ;;  %p1287_p11 = por %p1286_p10, %p1285_p9 }
0x1548   :  { %222 = vst.msk [vmem:[#allocation3 + $0x28] sm:$0xff] %vm216_vm2, %v1188_v5  ;;  %221 = vst.msk [vmem:[#allocation3 + $0x20] sm:$0xff] %vm216_vm2, %v1187_v18 }
0x1549   :  { %v611_v20 = vpop.permute.xlu1 %610  ;;  %p1288_p12 = pnand %p1287_p11, %p1281_p8 }
0x154a   :  { %614 = vst.msk [vmem:[#allocation3 + $0x20] sm:$0xff] %vm90_vm1, %v611_v20 }
0x154b   :  { %382 = vrot.lane.b32.xlu0 %v1456_v60, %s1312_s3 }
0x154d   :  { %v763_v34 = vpop.permute.xlu1 %762 }
0x154f   :  { %534 = vrot.lane.b32.xlu0 %v1488_v44, %s1312_s3 }
0x1551   :  { %v847_v39 = vld [vmem:[#allocation3 + $0x20] sm:$0xff] }
0x1553   :  { %1190 = vrot.lane.b32.xlu0 %v1189_v7, %s1312_s3 }
0x1557   :  { %686 = vrot.lane.b32.xlu0 %v1518_v24, %s1312_s3 }
0x15b5   :  { %v834_v25 = vpop.permute.xlu0 %833 }
0x15b6   :  { %v836_v12 = vmul.f32 %v834_v25, %v819_v55 }
0x15b8   :  { %838 = vrot.lane.b32.xlu0 %v836_v12, %s1312_s3 }
0x15b9   :  { %v1181_v27 = vpop.permute.xlu0 %1180 }
0x15ba   :  { %v1183_v28 = vunpack.i.h.bf16 %v1181_v27  ;;  %v1182_v60 = vunpack.i.l.bf16 %v1181_v27 }
0x15bc   :  { %220 = vst.msk [vmem:[#allocation3 + $0x18] sm:$0xff] %vm216_vm2, %v1183_v28  ;;  %219 = vst.msk [vmem:[#allocation3 + $0x10] sm:$0xff] %vm216_vm2, %v1182_v60 }
0x15bd   :  { %462 = vst.msk [vmem:[#allocation3 + $0x10] sm:$0xff] %vm90_vm1, %v459_v11  ;;  %v383_v8 = vpop.permute.xlu0 %382 }
0x15be   :  { %386 = vst.msk [vmem:[#allocation3 + $0x8] sm:$0xff] %vm90_vm1, %v383_v8 }
0x15c1   :  { %v535_v44 = vpop.permute.xlu0 %534 }
0x15c2   :  { %538 = vst.msk [vmem:[#allocation3 + $0x18] sm:$0xff] %vm90_vm1, %v535_v44 }
0x15c4   :  { %v845_v36 = vld [vmem:[#allocation3 + $0x10] sm:$0xff] }
0x15c5   :  { %v1191_v24 = vpop.permute.xlu0 %1190  ;;  %v844_v30 = vld [vmem:[#allocation3 + $0x8] sm:$0xff] }
0x15c6   :  { %v1193_v31 = vunpack.i.h.bf16 %v1191_v24  ;;  %v1192_v32 = vunpack.i.l.bf16 %v1191_v24  ;;  %v851_v33 = vpack.c.bf16 %v844_v30, %v843_v29 }
0x15c8   :  { %224 = vst.msk [vmem:[#allocation3 + $0x38] sm:$0xff] %vm216_vm2, %v1193_v31  ;;  %223 = vst.msk [vmem:[#allocation3 + $0x30] sm:$0xff] %vm216_vm2, %v1192_v32  ;;  %1156 = vmatprep.mubr.msk.bf16.mxu0 %vm894_vm3, %v851_v33 }
0x15c9   :  { %766 = vst.msk [vmem:[#allocation3 + $0x30] sm:$0xff] %vm90_vm1, %v763_v34  ;;  %v687_v35 = vpop.permute.xlu0 %686  ;;  %v846_v37 = vld [vmem:[#allocation3 + $0x18] sm:$0xff] }
0x15ca   :  { %690 = vst.msk [vmem:[#allocation3 + $0x28] sm:$0xff] %vm90_vm1, %v687_v35  ;;  %v852_v38 = vpack.c.bf16 %v846_v37, %v845_v36 }
0x15cc   :  { %1157 = vmatmul.mubr.msk.bf16.vlgmr.msra.gmra.mrb[12].mxu0 %vm894_vm3, %v852_v38 }
0x15d0   :  { %v849_v43 = vld [vmem:[#allocation3 + $0x30] sm:$0xff] }
0x15d1   :  { %v848_v40 = vld [vmem:[#allocation3 + $0x28] sm:$0xff] }
0x15d2   :  { %v853_v41 = vpack.c.bf16 %v848_v40, %v847_v39 }
0x15d4   :  { %1160 = vmatprep.mubr.msk.bf16.mxu0 %vm894_vm3, %v853_v41 }
0x162a   :  { %v839_v19 = vpop.permute.xlu0 %838 }
0x162b   :  { %842 = vst.msk [vmem:[#allocation3 + $0x38] sm:$0xff] %vm90_vm1, %v839_v19 }
0x1632   :  { %v850_v15 = vld [vmem:[#allocation3 + $0x38] sm:$0xff] }
0x1633   :  { %v854_v45 = vpack.c.bf16 %v850_v15, %v849_v43 }
0x1635   :  { %1161 = vmatmul.mubr.msk.bf16.gmra.mrb[16].mxu0 %vm894_vm3, %v854_v45 }
0x169f   :  { %v1158_v47 = vpop.f32.mrb[12].mxu0 }
0x16a0   :  { %v950_v48 = vadd.f32 %v1158_v47, %v1025_v46  ;;  %v941_v49 = vpop.f32.mrb[13].mxu0 }
0x16a1   :  { %v942_v50 = vadd.f32 %v1025_v46, %v941_v49  ;;  %v1159_v51 = vpop.f32.mrb[14].mxu0 }
0x16a2   :  { %1242 = vtanh.f32 %v950_v48  ;;  %v953_v52 = vadd.f32 %v1159_v51, %v1025_v46  ;;  %v944_v53 = vpop.f32.mrb[15].mxu0 }
0x16a3   :  { %1244 = vtanh.f32 %v942_v50  ;;  %v945_v54 = vadd.f32 %v1025_v46, %v944_v53 }
0x16a4   :  { %1246 = vtanh.f32 %v953_v52 }
0x16a5   :  { %1248 = vtanh.f32 %v945_v54 }
0x16ac   :  { %v1243_v55 = vpop.eup %1242 }
0x16ad   :  { %v1245_v56 = vpop.eup %1244  ;;  %982 = vst [vmem:[#allocation7 + $0x10] sm:$0xff] %v1243_v55 }
0x16ae   :  { %v1247_v57 = vpop.eup %1246  ;;  %980 = vst [vmem:[#allocation7] sm:$0xff] %v1245_v56 }
0x16af   :  { %v1249_v58 = vpop.eup %1248  ;;  %983 = vst [vmem:[#allocation7 + $0x18] sm:$0xff] %v1247_v57 }
0x16b0   :  { %981 = vst [vmem:[#allocation7 + $0x8] sm:$0xff] %v1249_v58 }
0x1708   :  { %v1162_v23 = vpop.f32.mrb[16].mxu0 }
0x1709   :  { %v966_v59 = vadd.f32 %v1162_v23, %v1025_v46  ;;  %v957_v61 = vpop.f32.mrb[17].mxu0 }
0x170a   :  { %v958_v3 = vadd.f32 %v1025_v46, %v957_v61  ;;  %v1163_v21 = vpop.f32.mrb[18].mxu0 }
0x170b   :  { %1250 = vtanh.f32 %v966_v59  ;;  %v969_v63 = vadd.f32 %v1163_v21, %v1025_v46  ;;  %v960_v42 = vpop.f32.mrb[19].mxu0 }
0x170c   :  { %1252 = vtanh.f32 %v958_v3  ;;  %v961_v1 = vadd.f32 %v1025_v46, %v960_v42 }
0x170d   :  { %1254 = vtanh.f32 %v969_v63 }
0x170e   :  { %1256 = vtanh.f32 %v961_v1 }
0x1715   :  { %v1251_v2 = vpop.eup %1250 }
0x1716   :  { %v1253_v6 = vpop.eup %1252  ;;  %986 = vst [vmem:[#allocation7 + $0x30] sm:$0xff] %v1251_v2 }
0x1717   :  { %v1255_v26 = vpop.eup %1254  ;;  %984 = vst [vmem:[#allocation7 + $0x20] sm:$0xff] %v1253_v6 }
0x1718   :  { %v1257_v62 = vpop.eup %1256  ;;  %987 = vst [vmem:[#allocation7 + $0x38] sm:$0xff] %v1255_v26 }
0x1719   :  { %985 = vst [vmem:[#allocation7 + $0x28] sm:$0xff] %v1257_v62 }
0x171a   :  { %1291 = shalt.err (!%p1288_p12)
}
0x171b   :  { %s1292_s11 = scalar_lea.hbm %s1613_s6, 1024 }
0x171c   :  { %p1293_p13 = scmp.ne.s32.totalorder %s1613_s6, %s1292_s11  ;;  %p1296_p0 = scmp.lt.u32.totalorder %s1292_s11, %s1613_s6 }
0x171e   :  { %p1298_p1 = pnand %p1296_p0, %p1293_p13 }
0x1720   :  { %1301 = shalt.err (!%p1298_p1)
}
0x1721   :  { %s1314_s2 = smov 128   ;;  %s1315_s16 = smov 8  }
0x1722   :  { %999 = dma.vmem_to_hbm [thread:$0]  %s994_s7, 1024, %s1613_s6, [#allocation6], %s1314_s2, %s1314_s2, %s1315_s16  }
0x1723   :  { %1304 = dma.done.wait [#allocation6], 1024  }
0x1724   :  { %1305 = vsyncadd [#allocation6], 4294966272 }
0x1725   :  { %1003 = vsyncpa [#allocation5], 1 }
0x1726   :  { %1004 = vsyncpa [#allocation6], 1 }

</bundles_post_ra>
